<compile_context>
chip_gen: v6e
topology: v6e:2x2x1
jax: 0.10.0
libtpu: 0.0.40
codegen_flags: <defaults>
</compile_context>

<pallas_src>
import jax
import jax.numpy as jnp
from jax.experimental import pallas as pl
from jax.experimental.pallas import tpu as pltpu

INPUT_SIZE = 100
HIDDEN_SIZE = 50
OUTPUT_SIZE = 8

SUBLANE = 8
HID_PAD = 128   # 50 -> 128 lanes (128 on all gens; see review item 8)


def _round_up(n, m):
    return ((n + m - 1) // m) * m


def _choose_tile(batch, max_tile):
    """Batch tile: big enough to amortize ~0.35us/step, small enough to give
    >=4 grid steps on large batches (>=2 per TensorCore on v7x megacore)."""
    max_tile = max(SUBLANE, (max_tile // SUBLANE) * SUBLANE)
    b8 = _round_up(max(batch, 1), SUBLANE)
    if b8 <= 2 * SUBLANE:
        return min(b8, max_tile)
    target = _round_up(pl.cdiv(b8, 4), SUBLANE)            # aim for >= 4 steps
    tile = max(min(target, max_tile), min(512, b8, max_tile))  # ...with a ~512-row floor
    return min(tile, b8)


def _mlp_kernel(x_ref, w1_ref, b1_ref, w2_ref, b2_ref, w3_ref, b3_ref, o_ref):
    mm_dt = w1_ref.dtype                       # f32, or bf16 when bf16_matmul=True
    x = x_ref[...].astype(mm_dt)               # (TB, 100) streamed raw from HBM

    # fc1 + ReLU (dropout is identity at inference)
    h1 = jnp.dot(x, w1_ref[...], preferred_element_type=jnp.float32) + b1_ref[...]
    h1 = jnp.maximum(h1, 0.0)                  # padded hidden lanes stay exactly 0

    # fc2 + ReLU
    h2 = jnp.dot(h1.astype(mm_dt), w2_ref[...],
                 preferred_element_type=jnp.float32) + b2_ref[...]
    h2 = jnp.maximum(h2, 0.0)

    # fc3 (zeroed padded rows of w3t keep padded lanes out of the logits)
    logits = jnp.dot(h2.astype(mm_dt), w3_ref[...],
                     preferred_element_type=jnp.float32) + b3_ref[...]

    # softmax along the feature axis (dim=1), max-subtracted
    m = jnp.max(logits, axis=1, keepdims=True)
    e = jnp.exp(logits - m)
    denom = jnp.sum(e, axis=1, keepdims=True)
    # EUP approx reciprocal + one Newton refinement (keeps the 1e-5 accuracy).
    r = pl.reciprocal(denom, approx=True)
    r = r * (2.0 - denom * r)
    o_ref[...] = (e * r).astype(o_ref.dtype)


def pack_params(params, bf16_matmul=False):
    """Pre-transpose weights to (in, out); pad only the N (and fc2/fc3 K) dims
    to 128 lanes; biases kept f32 as (1, N) rows for sublane broadcast."""
    wdt = jnp.bfloat16 if bf16_matmul else jnp.float32
    w1t = jnp.zeros((INPUT_SIZE, HID_PAD), wdt).at[:, :HIDDEN_SIZE].set(
        params["w1"].T.astype(wdt))                                  # (100, 128) K=100
    b1 = jnp.zeros((1, HID_PAD), jnp.float32).at[0, :HIDDEN_SIZE].set(params["b1"])
    w2t = jnp.zeros((HID_PAD, HID_PAD), wdt).at[:HIDDEN_SIZE, :HIDDEN_SIZE].set(
        params["w2"].T.astype(wdt))
    b2 = jnp.zeros((1, HID_PAD), jnp.float32).at[0, :HIDDEN_SIZE].set(params["b2"])
    w3t = jnp.zeros((HID_PAD, OUTPUT_SIZE), wdt).at[:HIDDEN_SIZE, :].set(
        params["w3"].T.astype(wdt))
    b3 = params["b3"].reshape(1, OUTPUT_SIZE).astype(jnp.float32)
    return w1t, b1, w2t, b2, w3t, b3


def can_frame_predictor(x, params, *, max_batch_tile=4096, bf16_matmul=False):
    """x: (B, INPUT_SIZE) float32; params: dict of fc{1,2,3} weights/biases (torch layout)."""
    B = x.shape[0]
    assert x.shape[1] == INPUT_SIZE
    if x.dtype != jnp.float32:
        x = x.astype(jnp.float32)

    TB = _choose_tile(B, max_batch_tile)
    grid = (pl.cdiv(B, TB),)                       # partial last tile is clipped by Pallas
    w1t, b1, w2t, b2, w3t, b3 = pack_params(params, bf16_matmul=bf16_matmul)

    cp_kwargs = dict(dimension_semantics=("parallel",))   # v7x: shard batch tiles across 2 TCs
    if TB >= 2048:
        # Large tiles: double-buffered (TB,128) x/out blocks + spilled intermediates
        # can exceed the default scoped-VMEM limit; raise it explicitly.
        cp_kwargs["vmem_limit_bytes"] = 48 * 1024 * 1024

    out = pl.pallas_call(
        _mlp_kernel,
        out_shape=jax.ShapeDtypeStruct((B, OUTPUT_SIZE), jnp.float32),
        grid=grid,
        in_specs=[
            # streamed, double-buffered raw-x batch tiles (no wrapper-side padding)
            pl.BlockSpec((TB, INPUT_SIZE), lambda i: (i, 0)),
            # weights / biases: constant index_map -> fetched once, VMEM-resident
            pl.BlockSpec((INPUT_SIZE, HID_PAD), lambda i: (0, 0)),
            pl.BlockSpec((1, HID_PAD), lambda i: (0, 0)),
            pl.BlockSpec((HID_PAD, HID_PAD), lambda i: (0, 0)),
            pl.BlockSpec((1, HID_PAD), lambda i: (0, 0)),
            pl.BlockSpec((HID_PAD, OUTPUT_SIZE), lambda i: (0, 0)),
            pl.BlockSpec((1, OUTPUT_SIZE), lambda i: (0, 0)),
        ],
        out_specs=pl.BlockSpec((TB, OUTPUT_SIZE), lambda i: (i, 0)),
        compiler_params=pltpu.CompilerParams(**cp_kwargs),
    )(x, w1t, b1, w2t, b2, w3t, b3)

    return out


def init_params(key):
    """Deterministic init mimicking nn.Linear's uniform(-1/sqrt(fan_in), +1/sqrt(fan_in))."""
    ks = jax.random.split(key, 6)

    def linear(kw, kb, fan_in, fan_out):
        bound = 1.0 / jnp.sqrt(jnp.float32(fan_in))
        w = jax.random.uniform(kw, (fan_out, fan_in), jnp.float32, -bound, bound)
        b = jax.random.uniform(kb, (fan_out,), jnp.float32, -bound, bound)
        return w, b

    w1, b1 = linear(ks[0], ks[1], INPUT_SIZE, HIDDEN_SIZE)
    w2, b2 = linear(ks[2], ks[3], HIDDEN_SIZE, HIDDEN_SIZE)
    w3, b3 = linear(ks[4], ks[5], HIDDEN_SIZE, OUTPUT_SIZE)
    return {"w1": w1, "b1": b1, "w2": w2, "b2": b2, "w3": w3, "b3": b3}


def _reference(x, p):
    h1 = jnp.maximum(x @ p["w1"].T + p["b1"], 0.0)
    h2 = jnp.maximum(h1 @ p["w2"].T + p["b2"], 0.0)
    logits = h2 @ p["w3"].T + p["b3"]
    return jax.nn.softmax(logits, axis=1)


if __name__ == "__main__":
    key = jax.random.PRNGKey(0)
    k_x1, k_x2, k_p = jax.random.split(key, 3)
    params = init_params(k_p)

    # 1) Small batch (single tile).
    B1 = 8
    x1 = jax.random.normal(k_x1, (B1, INPUT_SIZE), dtype=jnp.float32)
    out1 = jax.block_until_ready(can_frame_predictor(x1, params))
    ref1 = _reference(x1, params)
    assert out1.shape == (B1, OUTPUT_SIZE)
    assert jnp.allclose(out1, ref1, atol=1e-5, rtol=1e-5)
    assert jnp.allclose(jnp.sum(out1, axis=1), 1.0, atol=1e-5)

    # 2) Multi-step grid with a partial last tile (B not a multiple of the tile),
    #    resident weights reused across grid steps.
    B2 = 1003
    x2 = jax.random.normal(k_x2, (B2, INPUT_SIZE), dtype=jnp.float32)
    out2 = jax.block_until_ready(can_frame_predictor(x2, params))
    ref2 = _reference(x2, params)
    assert out2.shape == (B2, OUTPUT_SIZE)
    assert jnp.allclose(out2, ref2, atol=1e-5, rtol=1e-5)
    assert jnp.allclose(jnp.sum(out2, axis=1), 1.0, atol=1e-5)

    # 3) Optional bf16-matmul path (v5e MXU lever); looser tolerance by design.
    out3 = jax.block_until_ready(can_frame_predictor(x2, params, bf16_matmul=True))
    assert out3.shape == (B2, OUTPUT_SIZE)
    assert jnp.allclose(out3, ref2, atol=5e-2)
    assert jnp.allclose(jnp.sum(out3, axis=1), 1.0, atol=1e-4)

    print("KERNEL_OK")
</pallas_src>

<mosaic_0001>
module attributes {stable_mosaic.version = 11 : i64} {
  func.func @_mlp_kernel(%arg0: i32, %arg1: memref<8x100xf32, #tpu.memory_space<vmem>>, %arg2: memref<100x128xf32, #tpu.memory_space<vmem>>, %arg3: memref<1x128xf32, #tpu.memory_space<vmem>>, %arg4: memref<128x128xf32, #tpu.memory_space<vmem>>, %arg5: memref<1x128xf32, #tpu.memory_space<vmem>>, %arg6: memref<128x8xf32, #tpu.memory_space<vmem>>, %arg7: memref<1x8xf32, #tpu.memory_space<vmem>>, %arg8: memref<8x8xf32, #tpu.memory_space<vmem>>) attributes {dimension_semantics = [#tpu.dimension_semantics<parallel>], iteration_bounds = array<i64: 1>, scalar_prefetch = 0 : i64, scratch_operands = 0 : i64, tpu.core_type = #tpu.core_type<tc>, window_params = [{transform_indices = @transform_0, window_bounds = array<i64: 8, 100>}, {pipeline_mode = #tpu.pipeline_mode<synchronous>, transform_indices = @transform_1, window_bounds = array<i64: 100, 128>}, {pipeline_mode = #tpu.pipeline_mode<synchronous>, transform_indices = @transform_2, window_bounds = array<i64: 1, 128>}, {pipeline_mode = #tpu.pipeline_mode<synchronous>, transform_indices = @transform_3, window_bounds = array<i64: 128, 128>}, {pipeline_mode = #tpu.pipeline_mode<synchronous>, transform_indices = @transform_4, window_bounds = array<i64: 1, 128>}, {pipeline_mode = #tpu.pipeline_mode<synchronous>, transform_indices = @transform_5, window_bounds = array<i64: 128, 8>}, {pipeline_mode = #tpu.pipeline_mode<synchronous>, transform_indices = @transform_6, window_bounds = array<i64: 1, 8>}, {transform_indices = @transform_7, window_bounds = array<i64: 8, 8>}]} {
    %c0 = arith.constant 0 : index
    %c0_0 = arith.constant 0 : index
    %0 = vector.load %arg1[%c0, %c0_0] : memref<8x100xf32, #tpu.memory_space<vmem>>, vector<8x100xf32>
    %c0_1 = arith.constant 0 : index
    %c0_2 = arith.constant 0 : index
    %1 = vector.load %arg2[%c0_1, %c0_2] : memref<100x128xf32, #tpu.memory_space<vmem>>, vector<100x128xf32>
    %cst = arith.constant dense<0.000000e+00> : vector<8x128xf32>
    %2 = tpu.matmul %0, %1, %cst {dimension_numbers = #tpu.dot_dimension_numbers<[1], [0], [0], [1], [0, 0, 1, 1], [], []>} : vector<8x100xf32>, vector<100x128xf32>, vector<8x128xf32> -> vector<8x128xf32>
    %c0_3 = arith.constant 0 : index
    %c0_4 = arith.constant 0 : index
    %3 = vector.load %arg3[%c0_3, %c0_4] : memref<1x128xf32, #tpu.memory_space<vmem>>, vector<1x128xf32>
    %4 = vector.broadcast %3 : vector<1x128xf32> to vector<8x128xf32>
    %5 = arith.addf %2, %4 : vector<8x128xf32>
    %cst_5 = arith.constant 0.000000e+00 : f32
    %6 = vector.broadcast %cst_5 : f32 to vector<8x128xf32>
    %7 = arith.maximumf %5, %6 : vector<8x128xf32>
    %c0_6 = arith.constant 0 : index
    %c0_7 = arith.constant 0 : index
    %8 = vector.load %arg4[%c0_6, %c0_7] : memref<128x128xf32, #tpu.memory_space<vmem>>, vector<128x128xf32>
    %cst_8 = arith.constant dense<0.000000e+00> : vector<8x128xf32>
    %9 = tpu.matmul %7, %8, %cst_8 {dimension_numbers = #tpu.dot_dimension_numbers<[1], [0], [0], [1], [0, 0, 1, 1], [], []>} : vector<8x128xf32>, vector<128x128xf32>, vector<8x128xf32> -> vector<8x128xf32>
    %c0_9 = arith.constant 0 : index
    %c0_10 = arith.constant 0 : index
    %10 = vector.load %arg5[%c0_9, %c0_10] : memref<1x128xf32, #tpu.memory_space<vmem>>, vector<1x128xf32>
    %11 = vector.broadcast %10 : vector<1x128xf32> to vector<8x128xf32>
    %12 = arith.addf %9, %11 : vector<8x128xf32>
    %cst_11 = arith.constant 0.000000e+00 : f32
    %13 = vector.broadcast %cst_11 : f32 to vector<8x128xf32>
    %14 = arith.maximumf %12, %13 : vector<8x128xf32>
    %c0_12 = arith.constant 0 : index
    %c0_13 = arith.constant 0 : index
    %15 = vector.load %arg6[%c0_12, %c0_13] : memref<128x8xf32, #tpu.memory_space<vmem>>, vector<128x8xf32>
    %cst_14 = arith.constant dense<0.000000e+00> : vector<8x8xf32>
    %16 = tpu.matmul %14, %15, %cst_14 {dimension_numbers = #tpu.dot_dimension_numbers<[1], [0], [0], [1], [0, 0, 1, 1], [], []>} : vector<8x128xf32>, vector<128x8xf32>, vector<8x8xf32> -> vector<8x8xf32>
    %c0_15 = arith.constant 0 : index
    %c0_16 = arith.constant 0 : index
    %17 = vector.load %arg7[%c0_15, %c0_16] : memref<1x8xf32, #tpu.memory_space<vmem>>, vector<1x8xf32>
    %18 = vector.broadcast %17 : vector<1x8xf32> to vector<8x8xf32>
    %19 = arith.addf %16, %18 : vector<8x8xf32>
    %cst_17 = arith.constant dense<0xFF800000> : vector<8xf32>
    %20 = vector.multi_reduction <maximumf>, %19, %cst_17 [1] : vector<8x8xf32> to vector<8xf32>
    %21 = vector.shape_cast %20 : vector<8xf32> to vector<8x1xf32>
    %22 = vector.broadcast %21 : vector<8x1xf32> to vector<8x8xf32>
    %23 = arith.subf %19, %22 : vector<8x8xf32>
    %24 = math.exp %23 : vector<8x8xf32>
    %cst_18 = arith.constant dense<0.000000e+00> : vector<8xf32>
    %25 = vector.multi_reduction <add>, %24, %cst_18 [1] : vector<8x8xf32> to vector<8xf32>
    %26 = vector.shape_cast %25 : vector<8xf32> to vector<8x1xf32>
    %27 = tpu.reciprocal %26 {approx = true} : vector<8x1xf32> -> vector<8x1xf32>
    %28 = arith.mulf %26, %27 : vector<8x1xf32>
    %cst_19 = arith.constant 2.000000e+00 : f32
    %29 = vector.broadcast %cst_19 : f32 to vector<8x1xf32>
    %30 = arith.subf %29, %28 : vector<8x1xf32>
    %31 = arith.mulf %27, %30 : vector<8x1xf32>
    %32 = vector.broadcast %31 : vector<8x1xf32> to vector<8x8xf32>
    %33 = arith.mulf %24, %32 : vector<8x8xf32>
    %c0_20 = arith.constant 0 : index
    %c0_21 = arith.constant 0 : index
    %34 = vector.load %arg8[%c0_20, %c0_21] : memref<8x8xf32, #tpu.memory_space<vmem>>, vector<8x8xf32>
    tpu.vector_store %arg8[%c0_20, %c0_21], %33 {strides = array<i32>} : memref<8x8xf32, #tpu.memory_space<vmem>>, vector<8x8xf32>,
    return
  }
  func.func @transform_0(%arg0: i32) -> (i32, i32) {
    %c0_i32 = arith.constant 0 : i32
    %c0_i32_0 = arith.constant 0 : i32
    return %arg0, %c0_i32 : i32, i32
  }
  func.func @transform_1(%arg0: i32) -> (i32, i32) {
    %c0_i32 = arith.constant 0 : i32
    %c0_i32_0 = arith.constant 0 : i32
    %c0_i32_1 = arith.constant 0 : i32
    return %c0_i32, %c0_i32_0 : i32, i32
  }
  func.func @transform_2(%arg0: i32) -> (i32, i32) {
    %c0_i32 = arith.constant 0 : i32
    %c0_i32_0 = arith.constant 0 : i32
    %c0_i32_1 = arith.constant 0 : i32
    return %c0_i32, %c0_i32_0 : i32, i32
  }
  func.func @transform_3(%arg0: i32) -> (i32, i32) {
    %c0_i32 = arith.constant 0 : i32
    %c0_i32_0 = arith.constant 0 : i32
    %c0_i32_1 = arith.constant 0 : i32
    return %c0_i32, %c0_i32_0 : i32, i32
  }
  func.func @transform_4(%arg0: i32) -> (i32, i32) {
    %c0_i32 = arith.constant 0 : i32
    %c0_i32_0 = arith.constant 0 : i32
    %c0_i32_1 = arith.constant 0 : i32
    return %c0_i32, %c0_i32_0 : i32, i32
  }
  func.func @transform_5(%arg0: i32) -> (i32, i32) {
    %c0_i32 = arith.constant 0 : i32
    %c0_i32_0 = arith.constant 0 : i32
    %c0_i32_1 = arith.constant 0 : i32
    return %c0_i32, %c0_i32_0 : i32, i32
  }
  func.func @transform_6(%arg0: i32) -> (i32, i32) {
    %c0_i32 = arith.constant 0 : i32
    %c0_i32_0 = arith.constant 0 : i32
    %c0_i32_1 = arith.constant 0 : i32
    return %c0_i32, %c0_i32_0 : i32, i32
  }
  func.func @transform_7(%arg0: i32) -> (i32, i32) {
    %c0_i32 = arith.constant 0 : i32
    %c0_i32_0 = arith.constant 0 : i32
    return %arg0, %c0_i32 : i32, i32
  }
}

</mosaic_0001>

<bundles_post_ra>
// kernel: tpu_custom_call.1
= control target key start
LH: loop header
LB: loop body
LE: loop exit
PB: predicated region body
PF: predicated region fallthrough
CT: control target
= control target key end

     0   :  { %12 = vsyncpa [#allocation3], 0  ;;  %s816_s0 = inlined_call_operand.vmem [shape: f32[8,100], index: 0, kind: input, shape index: {}]   ;;  %s817_s1 = inlined_call_operand.hbm [shape: f32[100,128], index: 1, kind: input, shape index: {}]   ;;  %s818_s2 = inlined_call_operand.vmem [shape: f32[1,128], index: 2, kind: input, shape index: {}]   ;;  %s819_s3 = inlined_call_operand.vmem [shape: f32[128,128], index: 3, kind: input, shape index: {}]   ;;  %s820_s4 = inlined_call_operand.hbm [shape: f32[1,128], index: 4, kind: input, shape index: {}]   ;;  %s821_s5 = inlined_call_operand.vmem [shape: f32[128,8], index: 5, kind: input, shape index: {}]   ;;  %s822_s6 = inlined_call_operand.vmem [shape: f32[1,8], index: 6, kind: input, shape index: {}]   ;;  %s823_s7 = inlined_call_operand.hbm [shape: f32[8,8], index: 7, kind: output, shape index: {}]  }
   0x1   :  { %13 = vsyncpa [#allocation6], 0 }
   0x2   :  { %14 = vsyncpa [#allocation4], 0  ;;  %s601_s24 = smov [#allocation2]  }
   0x3   :  { %s22_s25 = sshll.u32 %s601_s24, 4  ;;  %s23_s25 = int_to_ptr.vmem [resolvable:$true] %s22_s25 }
   0x4   :  { %s543_s26 = scalar_lea.vmem %s23_s25, 1664  ;;  %p548_p1 = scmp.lt.s32.totalorder %s23_s25, %s23_s25 }
   0x5   :  { %p544_p0 = scmp.ne.s32.totalorder %s23_s25, %s543_s26  ;;  %p549_p2 = scmp.lt.s32.totalorder %s543_s26, %s543_s26 }
   0x7   :  { %p550_p3 = por %p549_p2, %p548_p1 }
   0x9   :  { %p551_p4 = pnand %p550_p3, %p544_p0 }
   0xb   :  { %554 = shalt.err (!%p551_p4)
}
   0xc   :  { %s602_s27 = smov 128   ;;  %s603_s28 = smov 8  }
   0xd   :  { %28 = dma.hbm_to_vmem [thread:$0]  %s817_s1, 1664, %s23_s25, [#allocation3], %s602_s27, %s602_s27, %s603_s28  }
   0xe   :  { %s604_s8 = smov [#allocation5]  }
   0xf   :  { %s39_s9 = sshll.u32 %s604_s8, 4  ;;  %s40_s9 = int_to_ptr.vmem [resolvable:$true] %s39_s9 }
  0x10   :  { %s563_s10 = scalar_lea.vmem %s40_s9, 16  ;;  %s567_s11 = scalar_lea.vmem %s40_s9, 32 }
  0x11   :  { %p564_p5 = scmp.ne.s32.totalorder %s40_s9, %s563_s10  ;;  %p568_p6 = scmp.lt.s32.totalorder %s40_s9, %s40_s9 }
  0x12   :  { %p569_p7 = scmp.lt.s32.totalorder %s567_s11, %s563_s10 }
  0x14   :  { %p570_p8 = por %p569_p7, %p568_p6 }
  0x16   :  { %p571_p9 = pnand %p570_p8, %p564_p5 }
  0x18   :  { %574 = shalt.err (!%p571_p9)
}
  0x19   :  { %42 = dma.hbm_to_vmem [thread:$0]  %s820_s4, 16, %s40_s9, [#allocation6]  }
  0x1a   :  { %595 = dma.done.wait [#allocation3], 1664  }
  0x1b   :  { %596 = vsyncadd [#allocation3], 4294965632 }
  0x1c   :  { %597 = dma.done.wait [#allocation6], 16  }
  0x1d   :  { %598 = vsyncadd [#allocation6], 4294967280  ;;  %v605_v0 = vmov 0.0   ;;  %vm606_vm0 = vmmov 0   ;;  %vm78_vm1 = vcmask 1043456   ;;  %v65_v2 = vld [vmem:[#allocation2 + $0x58] sm:$0xff] }
  0x1e   :  { %425 = vmatprep.subr.mxu0 %v605_v0  ;;  %451 = vmatprep.mubr.msk.f32.mxu0 %vm606_vm0, %v605_v0  ;;  %v66_v1 = vld [vmem:[#allocation2 + $0x60] sm:$0xf]  ;;  %v64_v3 = vld [vmem:[#allocation2 + $0x50] sm:$0xff]  ;;  %v63_v4 = vld [vmem:[#allocation2 + $0x48] sm:$0xff]  ;;  %vm74_vm2 = vcmask 818176   ;;  %vm340_vm3 = vcmask 64512  }
  0x1f   :  { %454 = vmatprep.subr.mxu1 %v605_v0  ;;  %486 = vmatprep.mubr.msk.f32.mxu1 %vm606_vm0, %v605_v0  ;;  %v168_v5 = vld [vmem:[%s819_s3 + $0x78] sm:$0xff]  ;;  %v167_v6 = vld [vmem:[%s819_s3 + $0x70] sm:$0xff]  ;;  %v62_v7 = vld [vmem:[#allocation2 + $0x40] sm:$0xff] }
  0x20   :  { %426 = vmatpush3.msk.msra.mxu0 %vm78_vm1, %v66_v1  ;;  %455 = vmatpush3.msra.mxu1 %v168_v5  ;;  %v166_v8 = vld [vmem:[%s819_s3 + $0x68] sm:$0xff]  ;;  %v61_v9 = vld [vmem:[#allocation2 + $0x38] sm:$0xff]  ;;  %v165_v10 = vld [vmem:[%s819_s3 + $0x60] sm:$0xff] }
  0x21   :  { %427 = vmatprep.subr.mxu0 %v605_v0  ;;  %456 = vmatprep.subr.mxu1 %v605_v0  ;;  %v60_v11 = vld [vmem:[#allocation2 + $0x30] sm:$0xff]  ;;  %v164_v12 = vld [vmem:[%s819_s3 + $0x58] sm:$0xff]  ;;  %v59_v13 = vld [vmem:[#allocation2 + $0x28] sm:$0xff] }
  0x22   :  { %428 = vmatpush3.msra.mxu0 %v65_v2  ;;  %457 = vmatpush3.msra.mxu1 %v167_v6  ;;  %v163_v14 = vld [vmem:[%s819_s3 + $0x50] sm:$0xff]  ;;  %v58_v15 = vld [vmem:[#allocation2 + $0x20] sm:$0xff]  ;;  %v162_v16 = vld [vmem:[%s819_s3 + $0x48] sm:$0xff] }
  0x23   :  { %429 = vmatprep.subr.mxu0 %v605_v0  ;;  %458 = vmatprep.subr.mxu1 %v605_v0  ;;  %v57_v17 = vld [vmem:[#allocation2 + $0x18] sm:$0xff]  ;;  %v161_v18 = vld [vmem:[%s819_s3 + $0x40] sm:$0xff]  ;;  %v56_v19 = vld [vmem:[#allocation2 + $0x10] sm:$0xff] }
  0x24   :  { %430 = vmatpush3.msra.mxu0 %v64_v3  ;;  %459 = vmatpush3.msra.mxu1 %v166_v8  ;;  %v160_v20 = vld [vmem:[%s819_s3 + $0x38] sm:$0xff]  ;;  %v55_v21 = vld [vmem:[#allocation2 + $0x8] sm:$0xff]  ;;  %v159_v22 = vld [vmem:[%s819_s3 + $0x30] sm:$0xff] }
  0x25   :  { %431 = vmatprep.subr.mxu0 %v605_v0  ;;  %460 = vmatprep.subr.mxu1 %v605_v0  ;;  %v54_v23 = vld [vmem:[#allocation2] sm:$0xff]  ;;  %v158_v24 = vld [vmem:[%s819_s3 + $0x28] sm:$0xff]  ;;  %v156_v27 = vld [vmem:[%s819_s3 + $0x18] sm:$0xff] }
  0x26   :  { %432 = vmatpush3.msra.mxu0 %v63_v4  ;;  %461 = vmatpush3.msra.mxu1 %v165_v10  ;;  %v53_v25 = vld [vmem:[%s816_s0] sm:$0xff]  ;;  %v155_v28 = vld [vmem:[%s819_s3 + $0x10] sm:$0xff]  ;;  %v154_v29 = vld [vmem:[%s819_s3 + $0x8] sm:$0xff] }
  0x27   :  { %433 = vmatprep.subr.mxu0 %v605_v0  ;;  %462 = vmatprep.subr.mxu1 %v605_v0  ;;  %v157_v26 = vld [vmem:[%s819_s3 + $0x20] sm:$0xff]  ;;  %v262_v31 = vld [vmem:[%s821_s5 + $0x78] sm:$0xff]  ;;  %v261_v32 = vld [vmem:[%s821_s5 + $0x70] sm:$0xff] }
  0x28   :  { %434 = vmatpush3.msra.mxu0 %v62_v7  ;;  %463 = vmatpush3.msra.mxu1 %v164_v12  ;;  %v153_v30 = vld [vmem:[%s819_s3] sm:$0xff]  ;;  %v260_v33 = vld [vmem:[%s821_s5 + $0x68] sm:$0xff]  ;;  %v258_v35 = vld [vmem:[%s821_s5 + $0x58] sm:$0xff] }
  0x29   :  { %435 = vmatprep.subr.mxu0 %v605_v0  ;;  %464 = vmatprep.subr.mxu1 %v605_v0  ;;  %v259_v34 = vld [vmem:[%s821_s5 + $0x60] sm:$0xff]  ;;  %v257_v36 = vld [vmem:[%s821_s5 + $0x50] sm:$0xff]  ;;  %v256_v37 = vld [vmem:[%s821_s5 + $0x48] sm:$0xff] }
  0x2a   :  { %436 = vmatpush3.msra.mxu0 %v61_v9  ;;  %465 = vmatpush3.msra.mxu1 %v163_v14  ;;  %v255_v38 = vld [vmem:[%s821_s5 + $0x40] sm:$0xff]  ;;  %v254_v39 = vld [vmem:[%s821_s5 + $0x38] sm:$0xff]  ;;  %v253_v40 = vld [vmem:[%s821_s5 + $0x30] sm:$0xff] }
  0x2b   :  { %437 = vmatprep.subr.mxu0 %v605_v0  ;;  %466 = vmatprep.subr.mxu1 %v605_v0  ;;  %v252_v41 = vld [vmem:[%s821_s5 + $0x28] sm:$0xff]  ;;  %v251_v42 = vld [vmem:[%s821_s5 + $0x20] sm:$0xff]  ;;  %v250_v43 = vld [vmem:[%s821_s5 + $0x18] sm:$0xff] }
  0x2c   :  { %438 = vmatpush3.msra.mxu0 %v60_v11  ;;  %467 = vmatpush3.msra.mxu1 %v162_v16  ;;  %v372_v44 = vld [vmem:[%s818_s2] ss:$0 sm:$0xff]  ;;  %v249_v49 = vld [vmem:[%s821_s5 + $0x10] sm:$0xff]  ;;  %v248_v50 = vld [vmem:[%s821_s5 + $0x8] sm:$0xff] }
  0x2d   :  { %439 = vmatprep.subr.mxu0 %v605_v0  ;;  %468 = vmatprep.subr.mxu1 %v605_v0  ;;  %v247_v51 = vld [vmem:[%s821_s5] sm:$0xff]  ;;  %v375_v52 = vld [vmem:[#allocation5] ss:$0 sm:$0xff]  ;;  %s607_s5 = smov [#allocation7]  }
  0x2e   :  { %440 = vmatpush3.msra.mxu0 %v59_v13  ;;  %469 = vmatpush3.msra.mxu1 %v161_v18  ;;  %v376_v57 = vld [vmem:[%s822_s6] ss:$0 sm:$0xff]  ;;  %s362_s6 = sshll.u32 %s607_s5, 4  ;;  %s363_s6 = int_to_ptr.vmem [resolvable:$true] %s362_s6 }
  0x2f   :  { %441 = vmatprep.subr.mxu0 %v605_v0  ;;  %470 = vmatprep.subr.mxu1 %v605_v0  ;;  %s575_s27 = scalar_lea.vmem %s363_s6, 128  ;;  %p580_p11 = scmp.lt.s32.totalorder %s363_s6, %s363_s6 }
  0x30   :  { %442 = vmatpush3.msra.mxu0 %v58_v15  ;;  %471 = vmatpush3.msra.mxu1 %v160_v20  ;;  %p576_p10 = scmp.ne.s32.totalorder %s363_s6, %s575_s27  ;;  %p581_p12 = scmp.lt.s32.totalorder %s575_s27, %s575_s27 }
  0x31   :  { %443 = vmatprep.subr.mxu0 %v605_v0  ;;  %472 = vmatprep.subr.mxu1 %v605_v0 }
  0x32   :  { %444 = vmatpush3.msra.mxu0 %v57_v17  ;;  %473 = vmatpush3.msra.mxu1 %v159_v22  ;;  %p582_p13 = por %p581_p12, %p580_p11 }
  0x33   :  { %445 = vmatprep.subr.mxu0 %v605_v0  ;;  %474 = vmatprep.subr.mxu1 %v605_v0 }
  0x34   :  { %446 = vmatpush3.msra.mxu0 %v56_v19  ;;  %475 = vmatpush3.msra.mxu1 %v158_v24  ;;  %p583_p0 = pnand %p582_p13, %p576_p10 }
  0x35   :  { %447 = vmatprep.subr.mxu0 %v605_v0  ;;  %476 = vmatprep.subr.mxu1 %v605_v0 }
  0x36   :  { %448 = vmatpush3.msra.mxu0 %v55_v21  ;;  %477 = vmatpush3.msra.mxu1 %v157_v26 }
  0x37   :  { %449 = vmatprep.subr.mxu0 %v605_v0  ;;  %478 = vmatprep.subr.mxu1 %v605_v0 }
  0x38   :  { %450 = vmatpush3.msra.mxu0 %v54_v23  ;;  %479 = vmatpush3.msra.mxu1 %v156_v27 }
  0x39   :  { %452 = vmatmul.mubr.msk.f32.vlgmr.msra.gmra.mxu0 %vm74_vm2, %v53_v25  ;;  %489 = vmatprep.subr.mxu0 %v605_v0 }
  0x3a   :  { %521 = vmatprep.mubr.msk.f32.mxu0 %vm606_vm0, %v605_v0  ;;  %480 = vmatprep.subr.mxu1 %v605_v0 }
  0x3b   :  { %481 = vmatpush3.msra.mxu1 %v155_v28  ;;  %490 = vmatpush3.msra.mxu0 %v262_v31 }
  0x3c   :  { %482 = vmatprep.subr.mxu1 %v605_v0  ;;  %491 = vmatprep.subr.mxu0 %v605_v0 }
  0x3d   :  { %483 = vmatpush3.msra.mxu1 %v154_v29  ;;  %492 = vmatpush3.msra.mxu0 %v261_v32 }
  0x3e   :  { %484 = vmatprep.subr.mxu1 %v605_v0  ;;  %493 = vmatprep.subr.mxu0 %v605_v0 }
  0x3f   :  { %485 = vmatpush3.msra.mxu1 %v153_v30  ;;  %494 = vmatpush3.msra.mxu0 %v260_v33 }
  0x40   :  { %495 = vmatprep.subr.mxu0 %v605_v0 }
  0x41   :  { %496 = vmatpush3.msra.mxu0 %v259_v34 }
  0x42   :  { %497 = vmatprep.subr.mxu0 %v605_v0 }
  0x43   :  { %498 = vmatpush3.msra.mxu0 %v258_v35 }
  0x44   :  { %499 = vmatprep.subr.mxu0 %v605_v0 }
  0x45   :  { %500 = vmatpush3.msra.mxu0 %v257_v36 }
  0x46   :  { %501 = vmatprep.subr.mxu0 %v605_v0 }
  0x47   :  { %502 = vmatpush3.msra.mxu0 %v256_v37 }
  0x48   :  { %503 = vmatprep.subr.mxu0 %v605_v0 }
  0x49   :  { %504 = vmatpush3.msra.mxu0 %v255_v38 }
  0x4a   :  { %505 = vmatprep.subr.mxu0 %v605_v0 }
  0x4b   :  { %506 = vmatpush3.msra.mxu0 %v254_v39 }
  0x4c   :  { %507 = vmatprep.subr.mxu0 %v605_v0 }
  0x4d   :  { %508 = vmatpush3.msra.mxu0 %v253_v40 }
  0x4e   :  { %509 = vmatprep.subr.mxu0 %v605_v0 }
  0x4f   :  { %510 = vmatpush3.msra.mxu0 %v252_v41 }
  0x50   :  { %511 = vmatprep.subr.mxu0 %v605_v0 }
  0x51   :  { %512 = vmatpush3.msra.mxu0 %v251_v42 }
  0x52   :  { %513 = vmatprep.subr.mxu0 %v605_v0 }
  0x53   :  { %514 = vmatpush3.msra.mxu0 %v250_v43 }
  0x54   :  { %515 = vmatprep.subr.mxu0 %v605_v0 }
  0x55   :  { %516 = vmatpush3.msra.mxu0 %v249_v49 }
  0x56   :  { %517 = vmatprep.subr.mxu0 %v605_v0 }
  0x57   :  { %518 = vmatpush3.msra.mxu0 %v248_v50 }
  0x58   :  { %519 = vmatprep.subr.mxu0 %v605_v0 }
  0x59   :  { %520 = vmatpush3.msra.mxu0 %v247_v51 }
  0xf9   :  { %v148_v45 = vpop.f32.mrf.mxu0 }
  0xfa   :  { %v149_v46 = vadd.f32 %v372_v44, %v148_v45 }
  0xfb   :  { %v453_v47 = vpop.f32.mrf.mxu0 }
  0xfc   :  { %v152_v48 = vmax.f32 %v149_v46, 0.0 }
  0xfe   :  { %487 = vmatmul.mubr.f32.vlgmr.msra.gmra.mxu1 %v152_v48 }
 0x1be   :  { %v242_v53 = vpop.f32.mrf.mxu1 }
 0x1bf   :  { %v243_v54 = vadd.f32 %v375_v52, %v242_v53 }
 0x1c0   :  { %v488_v55 = vpop.f32.mrf.mxu1 }
 0x1c1   :  { %v246_v56 = vmax.f32 %v243_v54, 0.0 }
 0x1c3   :  { %522 = vmatmul.mubr.f32.vlgmr.msra.gmra.mxu0 %v246_v56 }
 0x283   :  { %v336_v58 = vpop.f32.mrf.mxu0 }
 0x284   :  { %v337_v59 = vadd.f32 %v376_v57, %v336_v58 }
 0x285   :  { %v523_v60 = vpop.f32.mrf.mxu0 }
 0x286   :  { %v341_v61 = vsel %vm340_vm3, %v337_v59, -inf }
 0x287   :  { %342 = vmax.xlane.f32.xlu0 %v341_v61 }
 0x310   :  { %v343_v62 = vpop.xlane.xlu0 %342 }
 0x311   :  { %v344_v63 = vsub.f32 %v337_v59, %v343_v62 }
 0x313   :  { %v345_v0 = vmul.f32 1.442695, %v344_v63 }
 0x315   :  { %531 = vpow2.f32 %v345_v0 }
 0x322   :  { %v532_v1 = vpop.eup %531 }
 0x323   :  { %v347_v2 = vsel %vm340_vm3, %v532_v1, 0.0 }
 0x324   :  { %348 = vadd.xlane.f32.xlu0 %v347_v2 }
 0x3ad   :  { %v349_v3 = vpop.xlane.xlu0 %348 }
 0x3ae   :  { %533 = vrcp.f32 %v349_v3 }
 0x3bb   :  { %v534_v4 = vpop.eup %533 }
 0x3bc   :  { %v351_v5 = vmul.f32 %v534_v4, %v349_v3 }
 0x3be   :  { %v352_v6 = vsub.f32 2.0, %v351_v5 }
 0x3c0   :  { %v353_v7 = vmul.f32 %v534_v4, %v352_v6 }
 0x3c2   :  { %v354_v8 = vmul.f32 %v532_v1, %v353_v7 }
 0x3c4   :  { %355 = vst.msk [vmem:[#allocation7] sm:$0xff] %vm340_vm3, %v354_v8 }
 0x3c5   :  { %586 = shalt.err (!%p583_p0)
}
 0x3c6   :  { %365 = dma.vmem_to_hbm [thread:$0]  %s363_s6, 128, %s823_s7, [#allocation4]  }
 0x3c7   :  { %599 = dma.done.wait [#allocation4], 128  }
 0x3c8   :  { %600 = vsyncadd [#allocation4], 4294967168 }
 0x3c9   :  { %369 = vsyncpa [#allocation3], 1 }
 0x3ca   :  { %370 = vsyncpa [#allocation6], 1 }
 0x3cb   :  { %371 = vsyncpa [#allocation4], 1 }

</bundles_post_ra>
